<compile_context>
chip_gen: v7x
topology: tpu7x:2x2x1
jax: 0.10.0
libtpu: 0.0.40
codegen_flags: <defaults>
</compile_context>

<pallas_src>
import jax
import jax.numpy as jnp
from jax.experimental import pallas as pl
from jax.experimental.pallas import tpu as pltpu

N_OUTPUTS = 6
NC_PER_TASK = 1
NEG_FILL = -100000000000.0  # -1e11, exactly as in the PyTorch module
IN_FEATURES = 200
OUT_PAD = 128               # lane-dense output width (sliced back to 6 outside)
MAX_TILE_N = 2048           # rows per grid step (800 B/row -> ~1.6 MiB/tile read)


def _round_up(v, m):
    return ((v + m - 1) // m) * m


def _make_kernel(offset1, offset2):
    """Kernel with task offsets baked in at trace time (t is a Python int)."""

    def kernel(x_ref, w_ref, b_ref, o_ref):
        # x_ref: VMEM (tile_n, 200) f32
        # w_ref: VMEM (200, 128)   f32 (resident across tiles)
        # b_ref: VMEM (1, 128)     f32 (resident across tiles)
        # o_ref: VMEM (tile_n, 128) f32 (lane-dense, unmasked stores)
        pre = jnp.dot(x_ref[...], w_ref[...], preferred_element_type=jnp.float32)
        pre = pre + b_ref[...]
        # Static keep mask over columns [offset1, offset2); everything else
        # (including the 122 padding columns) is filled with -1e11.  Offsets
        # are Python ints, so this folds to a constant mask at compile time.
        col = jax.lax.broadcasted_iota(jnp.int32, (1, OUT_PAD), 1)
        keep = (col >= offset1) & (col < offset2)
        o_ref[...] = jnp.where(keep, pre, jnp.float32(NEG_FILL))

    return kernel


def incre_learning_forward(x, t, w, b, *, max_tile_n=MAX_TILE_N):
    """Pallas implementation of increLearning.forward(data, t).

    x: (N, 1, 200) float32 (PyTorch-style layout)
    t: python int, current task
    w: (200, 6) float32, b: (6,) float32  -- synthetic linear `net`
    returns: (N, 6) float32 masked logits
    """
    n = x.shape[0]
    x2d = x.reshape(n, IN_FEATURES).astype(jnp.float32)

    # Zero-pad the tiny weight/bias out to 128 lane-dense output columns.
    w_pad = jnp.zeros((IN_FEATURES, OUT_PAD), jnp.float32)
    w_pad = w_pad.at[:, :N_OUTPUTS].set(w.astype(jnp.float32))
    b_pad = jnp.zeros((1, OUT_PAD), jnp.float32)
    b_pad = b_pad.at[:, :N_OUTPUTS].set(jnp.reshape(b, (1, N_OUTPUTS)).astype(jnp.float32))

    offset1 = int(t) * NC_PER_TASK
    offset2 = (int(t) + 1) * NC_PER_TASK

    tile_n = min(max_tile_n, _round_up(n, 8))   # sublane-aligned row tile
    grid = (pl.cdiv(n, tile_n),)

    cost = pl.CostEstimate(
        flops=2 * n * IN_FEATURES * OUT_PAD,
        transcendentals=0,
        bytes_accessed=(n * IN_FEATURES * 4          # x read
                        + IN_FEATURES * OUT_PAD * 4  # w read (once)
                        + OUT_PAD * 4                # b read (once)
                        + n * OUT_PAD * 4),          # output write
    )

    out_padded = pl.pallas_call(
        _make_kernel(offset1, offset2),
        out_shape=jax.ShapeDtypeStruct((n, OUT_PAD), jnp.float32),
        grid=grid,
        in_specs=[
            pl.BlockSpec((tile_n, IN_FEATURES), lambda i: (i, 0)),   # x: tiled rows
            pl.BlockSpec((IN_FEATURES, OUT_PAD), lambda i: (0, 0)),  # w: resident
            pl.BlockSpec((1, OUT_PAD), lambda i: (0, 0)),            # b: resident
        ],
        out_specs=pl.BlockSpec((tile_n, OUT_PAD), lambda i: (i, 0)),
        compiler_params=pltpu.CompilerParams(
            dimension_semantics=("parallel",),       # shard rows across TCs on v7x
            vmem_limit_bytes=32 * 1024 * 1024,       # explicit; safe on v5e/v6e/v7x
        ),
        cost_estimate=cost,
    )(x2d, w_pad, b_pad)

    # Downstream consumers only ever see the real n_outputs columns.
    return out_padded[:, :N_OUTPUTS]


def _reference(x, t, w, b):
    n = x.shape[0]
    pre = x.reshape(n, IN_FEATURES) @ w + b
    offset1 = int(t * NC_PER_TASK)
    offset2 = int((t + 1) * NC_PER_TASK)
    if offset1 > 0:
        pre = pre.at[:, :offset1].set(NEG_FILL)
    if offset2 < N_OUTPUTS:
        pre = pre.at[:, offset2:N_OUTPUTS].set(NEG_FILL)
    return pre


if __name__ == "__main__":
    key = jax.random.PRNGKey(0)
    kx, kw, kb = jax.random.split(key, 3)

    batch = 8
    x = jax.random.normal(kx, (batch, 1, IN_FEATURES), dtype=jnp.float32)
    # Deterministic synthetic parameters for the wrapped `net` (linear layer).
    w = jax.random.normal(kw, (IN_FEATURES, N_OUTPUTS), dtype=jnp.float32) * 0.05
    b = jax.random.normal(kb, (N_OUTPUTS,), dtype=jnp.float32) * 0.05

    task = 2  # offset1 = 2 > 0 and offset2 = 3 < 6, exercises both fill branches

    out = incre_learning_forward(x, task, w, b)
    out = jax.block_until_ready(out)

    ref = _reference(x, task, w, b)
    assert out.shape == (batch, N_OUTPUTS)
    assert jnp.allclose(out, ref, atol=1e-4, rtol=1e-4), "mismatch vs reference"

    print("KERNEL_OK")
</pallas_src>

<mosaic_0001>
module attributes {stable_mosaic.version = 11 : i64} {
  func.func @kernel(%arg0: i32, %arg1: memref<8x200xf32, #tpu.memory_space<vmem>>, %arg2: memref<200x128xf32, #tpu.memory_space<vmem>>, %arg3: memref<1x128xf32, #tpu.memory_space<vmem>>, %arg4: memref<8x128xf32, #tpu.memory_space<vmem>>) attributes {dimension_semantics = [#tpu.dimension_semantics<parallel>], iteration_bounds = array<i64: 1>, scalar_prefetch = 0 : i64, scratch_operands = 0 : i64, tpu.core_type = #tpu.core_type<tc>, window_params = [{transform_indices = @transform_0, window_bounds = array<i64: 8, 200>}, {pipeline_mode = #tpu.pipeline_mode<synchronous>, transform_indices = @transform_1, window_bounds = array<i64: 200, 128>}, {pipeline_mode = #tpu.pipeline_mode<synchronous>, transform_indices = @transform_2, window_bounds = array<i64: 1, 128>}, {transform_indices = @transform_3, window_bounds = array<i64: 8, 128>}]} {
    %c0 = arith.constant 0 : index
    %c0_0 = arith.constant 0 : index
    %0 = vector.load %arg1[%c0, %c0_0] : memref<8x200xf32, #tpu.memory_space<vmem>>, vector<8x200xf32>
    %c0_1 = arith.constant 0 : index
    %c0_2 = arith.constant 0 : index
    %1 = vector.load %arg2[%c0_1, %c0_2] : memref<200x128xf32, #tpu.memory_space<vmem>>, vector<200x128xf32>
    %cst = arith.constant dense<0.000000e+00> : vector<8x128xf32>
    %2 = tpu.matmul %0, %1, %cst {dimension_numbers = #tpu.dot_dimension_numbers<[1], [0], [0], [1], [0, 0, 1, 1], [], []>} : vector<8x200xf32>, vector<200x128xf32>, vector<8x128xf32> -> vector<8x128xf32>
    %c0_3 = arith.constant 0 : index
    %c0_4 = arith.constant 0 : index
    %3 = vector.load %arg3[%c0_3, %c0_4] : memref<1x128xf32, #tpu.memory_space<vmem>>, vector<1x128xf32>
    %4 = vector.broadcast %3 : vector<1x128xf32> to vector<8x128xf32>
    %5 = arith.addf %2, %4 : vector<8x128xf32>
    %6 = tpu.iota {dimensions = array<i32: 1>} : vector<1x128xi32>
    %c2_i32 = arith.constant 2 : i32
    %7 = vector.broadcast %c2_i32 : i32 to vector<1x128xi32>
    %8 = arith.cmpi sge, %6, %7 : vector<1x128xi32>
    %c3_i32 = arith.constant 3 : i32
    %9 = vector.broadcast %c3_i32 : i32 to vector<1x128xi32>
    %10 = arith.cmpi slt, %6, %9 : vector<1x128xi32>
    %11 = arith.andi %8, %10 : vector<1x128xi1>
    %cst_5 = arith.constant -9.99999979E+10 : f32
    %12 = vector.shape_cast %11 : vector<1x128xi1> to vector<1x128xi1>
    %13 = vector.broadcast %12 : vector<1x128xi1> to vector<8x128xi1>
    %14 = vector.broadcast %cst_5 : f32 to vector<8x128xf32>
    %15 = arith.select %13, %5, %14 : vector<8x128xi1>, vector<8x128xf32>
    %c0_6 = arith.constant 0 : index
    %c0_7 = arith.constant 0 : index
    %16 = vector.load %arg4[%c0_6, %c0_7] : memref<8x128xf32, #tpu.memory_space<vmem>>, vector<8x128xf32>
    tpu.vector_store %arg4[%c0_6, %c0_7], %15 {strides = array<i32>} : memref<8x128xf32, #tpu.memory_space<vmem>>, vector<8x128xf32>,
    return
  }
  func.func @transform_0(%arg0: i32) -> (i32, i32) {
    %c0_i32 = arith.constant 0 : i32
    %c0_i32_0 = arith.constant 0 : i32
    return %arg0, %c0_i32 : i32, i32
  }
  func.func @transform_1(%arg0: i32) -> (i32, i32) {
    %c0_i32 = arith.constant 0 : i32
    %c0_i32_0 = arith.constant 0 : i32
    %c0_i32_1 = arith.constant 0 : i32
    return %c0_i32, %c0_i32_0 : i32, i32
  }
  func.func @transform_2(%arg0: i32) -> (i32, i32) {
    %c0_i32 = arith.constant 0 : i32
    %c0_i32_0 = arith.constant 0 : i32
    %c0_i32_1 = arith.constant 0 : i32
    return %c0_i32, %c0_i32_0 : i32, i32
  }
  func.func @transform_3(%arg0: i32) -> (i32, i32) {
    %c0_i32 = arith.constant 0 : i32
    %c0_i32_0 = arith.constant 0 : i32
    return %arg0, %c0_i32 : i32, i32
  }
}

</mosaic_0001>

<bundles_post_ra>
// kernel: tpu_custom_call.1
= control target key start
LH: loop header
LB: loop body
LE: loop exit
PB: predicated region body
PF: predicated region fallthrough
CT: control target
= control target key end

     0   :  { %8 = vsyncpa [#allocation3], 0  ;;  %s364_s0 = inlined_call_operand.hbm [shape: f32[8,200], index: 0, kind: input, shape index: {}]   ;;  %s365_s1 = inlined_call_operand.hbm [shape: f32[200,128], index: 1, kind: input, shape index: {}]   ;;  %s366_s2 = inlined_call_operand.vmem [shape: f32[1,128], index: 2, kind: input, shape index: {}]   ;;  %s367_s3 = inlined_call_operand.hbm [shape: f32[8,128], index: 3, kind: output, shape index: {}]  }
   0x1   :  { %9 = vsyncpa [#allocation6], 0 }
   0x2   :  { %10 = vsyncpa [#allocation4], 0  ;;  %s291_s12 = smov [#allocation2]   ;;  %s292_s14 = smov [#allocation5]  }
   0x3   :  { %s17_s13 = sshll.u32 %s291_s12, 4  ;;  %s26_s15 = sshll.u32 %s292_s14, 4  ;;  %s18_s13 = int_to_ptr.vmem [resolvable:$true] %s17_s13  ;;  %s318_s15 = int_to_ptr.vmem [resolvable:$true] %s26_s15 }
   0x4   :  { %s219_s18 = scalar_lea.hbm %s364_s0, 256 }
   0x5   :  { %p220_p0 = scmp.ne.s32.totalorder %s364_s0, %s219_s18  ;;  %p223_p1 = scmp.lt.u32.totalorder %s219_s18, %s364_s0 }
   0x7   :  { %p225_p2 = pnand %p223_p1, %p220_p0 }
   0x9   :  { %228 = shalt.err (!%p225_p2)
}
   0xa   :  { %s229_s23 = scalar_lea.vmem %s18_s13, 256  ;;  %p234_p4 = scmp.lt.s32.totalorder %s18_s13, %s18_s13 }
   0xb   :  { %p230_p3 = scmp.ne.s32.totalorder %s18_s13, %s229_s23  ;;  %p235_p5 = scmp.lt.s32.totalorder %s229_s23, %s229_s23 }
   0xd   :  { %p236_p6 = por %p235_p5, %p234_p4 }
   0xf   :  { %p237_p7 = pnand %p236_p6, %p230_p3 }
  0x11   :  { %240 = shalt.err (!%p237_p7)
}
  0x12   :  { %20 = dma.hbm_to_vmem [thread:$0]  %s364_s0, 256, %s18_s13, [#allocation3]  }
  0x13   :  { %s241_s28 = scalar_lea.hbm %s365_s1, 3200 }
  0x14   :  { %p242_p8 = scmp.ne.s32.totalorder %s365_s1, %s241_s28  ;;  %p245_p9 = scmp.lt.u32.totalorder %s241_s28, %s365_s1 }
  0x16   :  { %p247_p10 = pnand %p245_p9, %p242_p8 }
  0x18   :  { %250 = shalt.err (!%p247_p10)
}
  0x19   :  { %s251_s6 = scalar_lea.vmem %s318_s15, 3200  ;;  %p256_p12 = scmp.lt.s32.totalorder %s318_s15, %s318_s15 }
  0x1a   :  { %p252_p11 = scmp.ne.s32.totalorder %s318_s15, %s251_s6  ;;  %p257_p13 = scmp.lt.s32.totalorder %s251_s6, %s251_s6 }
  0x1c   :  { %p258_p0 = por %p257_p13, %p256_p12 }
  0x1e   :  { %p259_p1 = pnand %p258_p0, %p252_p11 }
  0x20   :  { %262 = shalt.err (!%p259_p1)
}
  0x21   :  { %s293_s0 = smov 128   ;;  %s294_s7 = smov 8  }
  0x22   :  { %32 = dma.hbm_to_vmem [thread:$0]  %s365_s1, 3200, %s318_s15, [#allocation6], %s293_s0, %s293_s0, %s294_s7  }
  0x23   :  { %285 = dma.done.wait [#allocation3], 256  }
  0x24   :  { %286 = vsyncadd [#allocation3], 4294967040 }
  0x25   :  { %287 = dma.done.wait [#allocation6], 3200  }
  0x26   :  { %288 = vsyncadd [#allocation6], 4294964096  ;;  %v295_v0 = vmov 0.0|0.0   ;;  %v43_v1 = vld [vmem:[#allocation5] sm:$0xff]  ;;  %v44_v2 = vld [vmem:[#allocation5 + $0x8] sm:$0xff]  ;;  %vm75_vm0 = vcmask 588800   ;;  %v149_v41 = vlaneseq }
  0x27   :  { %176 = vmatprep.subr.bf16.mxu0 %v295_v0  ;;  %v45_v3 = vld [vmem:[#allocation5 + $0x10] sm:$0xff]  ;;  %v177_v4 = vpack.c.bf16 %v44_v2, %v43_v1  ;;  %v46_v5 = vld [vmem:[#allocation5 + $0x18] sm:$0xff]  ;;  %v47_v7 = vld [vmem:[#allocation5 + $0x20] sm:$0xff]  ;;  %v296_v38 = vmov 0.0   ;;  %s297_s11 = smov [#allocation7]  }
  0x28   :  { %v180_v6 = vpack.c.bf16 %v46_v5, %v45_v3  ;;  %v48_v8 = vld [vmem:[#allocation5 + $0x28] sm:$0xff]  ;;  %v49_v10 = vld [vmem:[#allocation5 + $0x30] sm:$0xff]  ;;  %v50_v11 = vld [vmem:[#allocation5 + $0x38] sm:$0xff]  ;;  %v150_v42 = vand.u32 127, %v149_v41  ;;  %s164_s12 = sshll.u32 %s297_s11, 4  ;;  %s165_s12 = int_to_ptr.vmem [resolvable:$true] %s164_s12 }
  0x29   :  { %178 = vmatpush1.bf16.msra.mxu0 %v177_v4  ;;  %v183_v9 = vpack.c.bf16 %v48_v8, %v47_v7  ;;  %v42_v12 = vld [vmem:[#allocation2 + $0x8] sm:$0xff]  ;;  %v186_v13 = vpack.c.bf16 %v50_v11, %v49_v10  ;;  %v51_v14 = vld [vmem:[#allocation5 + $0x40] sm:$0xff]  ;;  %v52_v15 = vld [vmem:[#allocation5 + $0x48] sm:$0xff]  ;;  %s263_s13 = scalar_lea.vmem %s165_s12, 128  ;;  %p268_p3 = scmp.lt.s32.totalorder %s165_s12, %s165_s12 }
  0x2a   :  { %179 = vmatprep.subr.bf16.mxu0 %v295_v0  ;;  %175 = vmatprep.mubr.msk.f32.mxu0 %vm75_vm0, %v42_v12  ;;  %v189_v16 = vpack.c.bf16 %v52_v15, %v51_v14  ;;  %v53_v17 = vld [vmem:[#allocation5 + $0x50] sm:$0xff]  ;;  %v54_v18 = vld [vmem:[#allocation5 + $0x58] sm:$0xff]  ;;  %v55_v20 = vld [vmem:[#allocation5 + $0x60] sm:$0xff]  ;;  %vm151_vm1 = vcmp.ge.s32.totalorder %v150_v42, 2  ;;  %vm152_vm2 = vcmp.lt.s32.totalorder %v150_v42, 3  ;;  %p264_p2 = scmp.ne.s32.totalorder %s165_s12, %s263_s13  ;;  %p269_p4 = scmp.lt.s32.totalorder %s263_s13, %s263_s13 }
  0x2b   :  { %v192_v19 = vpack.c.bf16 %v54_v18, %v53_v17  ;;  %v56_v21 = vld [vmem:[#allocation5 + $0x68] sm:$0xff]  ;;  %v57_v23 = vld [vmem:[#allocation5 + $0x70] sm:$0xff]  ;;  %v58_v24 = vld [vmem:[#allocation5 + $0x78] sm:$0xff] }
  0x2c   :  { %v195_v22 = vpack.c.bf16 %v56_v21, %v55_v20  ;;  %v198_v25 = vpack.c.bf16 %v58_v24, %v57_v23  ;;  %v59_v26 = vld [vmem:[#allocation5 + $0x80] sm:$0xff]  ;;  %v60_v27 = vld [vmem:[#allocation5 + $0x88] sm:$0xff]  ;;  %v61_v29 = vld [vmem:[#allocation5 + $0x90] sm:$0xff]  ;;  %p270_p5 = por %p269_p4, %p268_p3 }
  0x2d   :  { %181 = vmatpush1.bf16.msra.mxu0 %v180_v6  ;;  %v201_v28 = vpack.c.bf16 %v60_v27, %v59_v26  ;;  %v62_v30 = vld [vmem:[#allocation5 + $0x98] sm:$0xff]  ;;  %v63_v32 = vld [vmem:[#allocation5 + $0xa0] sm:$0xff]  ;;  %v64_v33 = vld [vmem:[#allocation5 + $0xa8] sm:$0xff] }
  0x2e   :  { %182 = vmatprep.subr.bf16.mxu0 %v295_v0  ;;  %v204_v31 = vpack.c.bf16 %v62_v30, %v61_v29  ;;  %v207_v34 = vpack.c.bf16 %v64_v33, %v63_v32  ;;  %v65_v35 = vld [vmem:[#allocation5 + $0xb0] sm:$0xff]  ;;  %v66_v36 = vld [vmem:[#allocation5 + $0xb8] sm:$0xff]  ;;  %v67_v39 = vld [vmem:[#allocation5 + $0xc0] sm:$0xff]  ;;  %p271_p6 = pnand %p270_p5, %p264_p2 }
  0x2f   :  { %v210_v37 = vpack.c.bf16 %v66_v36, %v65_v35  ;;  %v41_v40 = vld [vmem:[#allocation2] sm:$0xff]  ;;  %vm153_vm3 = vmand %vm151_vm1, %vm152_vm2 }
  0x30   :  { %v174_v43 = vld [vmem:[%s366_s2] ss:$0 sm:$0xff] }
  0x31   :  { %184 = vmatpush1.bf16.msra.mxu0 %v183_v9 }
  0x32   :  { %185 = vmatprep.subr.bf16.mxu0 %v295_v0 }
  0x35   :  { %187 = vmatpush1.bf16.msra.mxu0 %v186_v13 }
  0x36   :  { %188 = vmatprep.subr.bf16.mxu0 %v295_v0 }
  0x39   :  { %190 = vmatpush1.bf16.msra.mxu0 %v189_v16 }
  0x3a   :  { %191 = vmatprep.subr.bf16.mxu0 %v295_v0 }
  0x3d   :  { %193 = vmatpush1.bf16.msra.mxu0 %v192_v19 }
  0x3e   :  { %194 = vmatprep.subr.bf16.mxu0 %v295_v0 }
  0x41   :  { %196 = vmatpush1.bf16.msra.mxu0 %v195_v22 }
  0x42   :  { %197 = vmatprep.subr.bf16.mxu0 %v295_v0 }
  0x45   :  { %199 = vmatpush1.bf16.msra.mxu0 %v198_v25 }
  0x46   :  { %200 = vmatprep.subr.bf16.mxu0 %v295_v0 }
  0x49   :  { %202 = vmatpush1.bf16.msra.mxu0 %v201_v28 }
  0x4a   :  { %203 = vmatprep.subr.bf16.mxu0 %v295_v0 }
  0x4d   :  { %205 = vmatpush1.bf16.msra.mxu0 %v204_v31 }
  0x4e   :  { %206 = vmatprep.subr.bf16.mxu0 %v295_v0 }
  0x51   :  { %208 = vmatpush1.bf16.msra.mxu0 %v207_v34 }
  0x52   :  { %209 = vmatprep.subr.bf16.mxu0 %v295_v0 }
  0x55   :  { %211 = vmatpush1.bf16.msra.mxu0 %v210_v37 }
  0x56   :  { %127 = vmatprep.subr.mxu0 %v296_v38 }
  0x59   :  { %128 = vmatpush1.msra.mxu0 %v67_v39 }
  0x5a   :  { %144 = vmatmul.mubr.f32.vlgmr.msra.gmra.mrb[0].mxu0 %v41_v40 }
 0x12d   :  { %v145_v44 = vpop.f32.mrb[0].mxu0 }
 0x12e   :  { %v146_v45 = vadd.f32 %v174_v43, %v145_v44  ;;  %v147_v46 = vpop.f32.mrb[1].mxu0 }
 0x130   :  { %v156_v47 = vsel %vm153_vm3, %v146_v45, -1e+11 }
 0x131   :  { %157 = vst [vmem:[#allocation7] sm:$0xff] %v156_v47 }
 0x132   :  { %274 = shalt.err (!%p271_p6)
}
 0x133   :  { %s275_s2 = scalar_lea.hbm %s367_s3, 128 }
 0x134   :  { %p276_p7 = scmp.ne.s32.totalorder %s367_s3, %s275_s2  ;;  %p279_p8 = scmp.lt.u32.totalorder %s275_s2, %s367_s3 }
 0x136   :  { %p281_p9 = pnand %p279_p8, %p276_p7 }
 0x138   :  { %284 = shalt.err (!%p281_p9)
}
 0x139   :  { %167 = dma.vmem_to_hbm [thread:$0]  %s165_s12, 128, %s367_s3, [#allocation4]  }
 0x13a   :  { %289 = dma.done.wait [#allocation4], 128  }
 0x13b   :  { %290 = vsyncadd [#allocation4], 4294967168 }
 0x13c   :  { %171 = vsyncpa [#allocation3], 1 }
 0x13d   :  { %172 = vsyncpa [#allocation6], 1 }
 0x13e   :  { %173 = vsyncpa [#allocation4], 1 }

</bundles_post_ra>
